<compile_context>
chip_gen: v6e
topology: v6e:2x2x1
jax: 0.10.0
libtpu: 0.0.40
codegen_flags: <defaults>
</compile_context>

<pallas_src>
import jax
import jax.numpy as jnp
from jax.experimental import pallas as pl
from jax.experimental.pallas import tpu as pltpu


_INV_SQRT2 = 0.7071067811865476


def _gelu_exact(x):
    """erf-based GELU matching torch.nn.GELU() (default, non-tanh).

    Abramowitz & Stegun 7.1.26 erf approximation (max abs err ~1.5e-7), built
    only from ops that lower cleanly in Mosaic (exp/abs/where).  It only
    touches the (·, Cr) squeeze vector, so the end-to-end error is far below
    the test tolerance.
    """
    z = x * _INV_SQRT2
    a = jnp.abs(z)
    t = 1.0 / (1.0 + 0.3275911 * a)
    poly = t * (0.254829592 + t * (-0.284496736 + t * (1.421413741 +
               t * (-1.453152027 + t * 1.061405429))))
    erf_a = 1.0 - poly * jnp.exp(-a * a)
    erf = jnp.where(z >= 0, erf_a, -erf_a)
    return 0.5 * x * (1.0 + erf)


# --------------------------------------------------------------------------
# Path A: one (TB, C, HW) slab per grid step (small / medium images).
# --------------------------------------------------------------------------
def _calayer_kernel_fused(x_ref, w1t_ref, b1_ref, w2_ref, b2_ref, out_ref):
    # x block: (TB, C, HW).  Lanes = HW (lane dense, full extent), sublanes = C.
    x = x_ref[...]                                      # native dtype, no f32 slab copy

    # ---- global average pool: f32-accumulating lane reduce (1/HW folded into w1t) ----
    s = jnp.sum(x, axis=-1, dtype=jnp.float32)          # (TB, C)

    # ---- 1x1 conv #1 + exact GELU (tiny; VPU broadcast + reduce, off the MXU) ----
    z1 = jnp.sum(s[:, :, None] * w1t_ref[...][None, :, :], axis=1) + b1_ref[...]   # (TB, Cr)
    z1 = _gelu_exact(z1)

    # ---- 1x1 conv #2 + sigmoid ----
    z2 = jnp.sum(z1[:, None, :] * w2_ref[...][None, :, :], axis=2) + b2_ref[...]   # (TB, C)
    scale = jax.nn.sigmoid(z2)                          # (TB, C)

    # ---- channel-wise rescale in the native dtype (lane broadcast of (TB,C,1)) ----
    out_ref[...] = (x * scale.astype(x.dtype)[:, :, None]).astype(out_ref.dtype)


# --------------------------------------------------------------------------
# Path B: two-phase HW-tiled kernel (large images / tight VMEM, esp. v7x).
#   grid = (N, 2, hw_tiles):  phase 0 accumulates the pooled sum into VMEM
#   scratch, phase 1 computes the SE scale once (t == 0) then rescales tiles.
# --------------------------------------------------------------------------
def _make_calayer_tiled_kernel(hw_total, hw_tile):
    needs_mask = (hw_total % hw_tile) != 0

    def kernel(x_ref, w1t_ref, b1_ref, w2_ref, b2_ref, out_ref, acc_ref, scale_ref):
        p = pl.program_id(1)     # phase: 0 = accumulate pooled sum, 1 = rescale
        t = pl.program_id(2)     # HW tile index

        @pl.when(jnp.logical_and(p == 0, t == 0))
        def _():
            acc_ref[...] = jnp.zeros_like(acc_ref)

        @pl.when(p == 0)
        def _():
            x = x_ref[0]                                            # (C, hw_tile)
            if needs_mask:
                col = jax.lax.broadcasted_iota(jnp.int32, x.shape, 1) + t * hw_tile
                x = jnp.where(col < hw_total, x, jnp.zeros_like(x))
            acc_ref[...] += jnp.sum(x, axis=-1, keepdims=True, dtype=jnp.float32)

        @pl.when(jnp.logical_and(p == 1, t == 0))
        def _():
            s = acc_ref[...]                                                      # (C, 1)
            z1 = jnp.sum(w1t_ref[...] * s, axis=0, keepdims=True) + b1_ref[...]   # (1, Cr)
            z1 = _gelu_exact(z1)
            z2 = jnp.sum(w2_ref[...] * z1, axis=1, keepdims=True) + b2_ref[...]   # (C, 1)
            scale_ref[...] = jax.nn.sigmoid(z2)

        @pl.when(p == 1)
        def _():
            out_ref[0] = (x_ref[0] * scale_ref[...].astype(x_ref.dtype)
                          ).astype(out_ref.dtype)

    return kernel


def _pick_tb(n, sample_bytes, target_bytes):
    """Largest divisor of n with tb*sample_bytes <= target, keeping >= 2 grid steps."""
    cap = max(1, target_bytes // max(sample_bytes, 1))
    if n >= 2:
        cap = min(cap, n // 2)          # keep >= 2 parallel steps (v7x megacore)
    tb = 1
    for d in range(1, n + 1):
        if n % d == 0 and d <= cap:
            tb = d
    return tb


def calayer_pallas(x_nchw, w1, b1, w2, b2, *, hw_tile=None):
    """CALayer forward.

    x_nchw : (N, C, H, W)
    w1     : (Cr, C)   nn.Conv2d(C, Cr, 1) weight (squeezed), b1: (Cr,)
    w2     : (C, Cr)   nn.Conv2d(Cr, C, 1) weight (squeezed), b2: (C,)
    hw_tile: optional override forcing the HW-tiled two-phase path (must be a
             multiple of 128).  Mainly for testing the large-image path.
    """
    N, C, H, W = x_nchw.shape
    Cr = w1.shape[0]
    HW = H * W
    itemsize = x_nchw.dtype.itemsize
    sample_bytes = C * HW * itemsize

    # Free reshape (contiguous); no transpose / pad HBM round trips.
    x2 = x_nchw.reshape(N, C, HW)

    # Preprocess weights once: fold 1/(H*W) of the average pool into w1 and
    # orient everything so the kernel never needs a transpose/relayout.
    w1t = jnp.asarray(w1, jnp.float32).T / float(HW)        # (C, Cr)
    b1r = jnp.asarray(b1, jnp.float32).reshape(1, Cr)       # (1, Cr)
    w2m = jnp.asarray(w2, jnp.float32)                      # (C, Cr)

    # VMEM budget derived from the chip (64 MiB on v7x, 128 MiB on v5e/v6e),
    # with headroom for the compiler's own scratch.  Never exceed physical VMEM.
    try:
        vmem_cap = int(pltpu.get_tpu_info().vmem_capacity_bytes)
    except Exception:
        vmem_cap = 64 << 20                                 # conservative: v7x
    vmem_budget = min(vmem_cap * 3 // 4, 96 << 20)          # <= 48 MiB on v7x

    TARGET_BLOCK = 8 << 20                                  # ~2-8 MiB per grid step
    weights_bytes = (2 * C * Cr + C + Cr) * 4
    fused_need = 4 * sample_bytes + weights_bytes + (4 << 20)   # dbl-buffered in+out

    use_tiled = (hw_tile is not None) or (fused_need > vmem_budget and HW >= 256)
    out_shape = jax.ShapeDtypeStruct((N, C, HW), x_nchw.dtype)

    if not use_tiled:
        # ------------- Path A: (TB, C, HW) slab per grid step -------------
        tb = _pick_tb(N, sample_bytes, TARGET_BLOCK)
        block_bytes = tb * sample_bytes
        vmem_limit = int(min(max(4 * block_bytes + weights_bytes + (4 << 20), 16 << 20),
                             vmem_budget))
        b2r = jnp.asarray(b2, jnp.float32).reshape(1, C)
        cost = pl.CostEstimate(
            flops=2 * N * C * HW + 4 * N * C * Cr,
            transcendentals=N * (C + Cr),
            bytes_accessed=2 * N * C * HW * itemsize)

        out = pl.pallas_call(
            _calayer_kernel_fused,
            out_shape=out_shape,
            grid_spec=pltpu.PrefetchScalarGridSpec(
                num_scalar_prefetch=0,
                grid=(N // tb,),
                in_specs=[
                    pl.BlockSpec((tb, C, HW), lambda n: (n, 0, 0)),
                    pl.BlockSpec((C, Cr), lambda n: (0, 0)),
                    pl.BlockSpec((1, Cr), lambda n: (0, 0)),
                    pl.BlockSpec((C, Cr), lambda n: (0, 0)),
                    pl.BlockSpec((1, C), lambda n: (0, 0)),
                ],
                out_specs=pl.BlockSpec((tb, C, HW), lambda n: (n, 0, 0)),
            ),
            compiler_params=pltpu.CompilerParams(
                dimension_semantics=("parallel",),
                vmem_limit_bytes=vmem_limit),
            cost_estimate=cost,
        )(x2, w1t, b1r, w2m, b2r)
    else:
        # ------------- Path B: two-phase HW-tiled (large images) -------------
        if hw_tile is None:
            lane_budget = max(128, (TARGET_BLOCK // max(C * itemsize, 1)) // 128 * 128)
            hw_tile = int(min(lane_budget, (HW // 128) * 128))
        assert hw_tile % 128 == 0 and 0 < hw_tile <= HW, "hw_tile must be a multiple of 128 and <= H*W"
        hw_tiles = (HW + hw_tile - 1) // hw_tile
        tile_bytes = C * hw_tile * itemsize
        vmem_limit = int(min(max(4 * tile_bytes + weights_bytes + (4 << 20), 16 << 20),
                             vmem_budget))
        b2c = jnp.asarray(b2, jnp.float32).reshape(C, 1)
        cost = pl.CostEstimate(
            flops=3 * N * C * HW + 4 * N * C * Cr,
            transcendentals=N * (C + Cr),
            bytes_accessed=3 * N * C * HW * itemsize)       # x read twice + out once

        out = pl.pallas_call(
            _make_calayer_tiled_kernel(HW, hw_tile),
            out_shape=out_shape,
            grid_spec=pltpu.PrefetchScalarGridSpec(
                num_scalar_prefetch=0,
                grid=(N, 2, hw_tiles),
                in_specs=[
                    pl.BlockSpec((1, C, hw_tile), lambda n, p, t: (n, 0, t)),
                    pl.BlockSpec((C, Cr), lambda n, p, t: (0, 0)),
                    pl.BlockSpec((1, Cr), lambda n, p, t: (0, 0)),
                    pl.BlockSpec((C, Cr), lambda n, p, t: (0, 0)),
                    pl.BlockSpec((C, 1), lambda n, p, t: (0, 0)),
                ],
                # Phase 0 never writes: pin its output block to tile 0 (which is
                # overwritten at phase 1, t = 0 before any writeback), so no
                # garbage / duplicate HBM writes are issued.
                out_specs=pl.BlockSpec((1, C, hw_tile), lambda n, p, t: (n, 0, t * p)),
                scratch_shapes=[pltpu.VMEM((C, 1), jnp.float32),
                                pltpu.VMEM((C, 1), jnp.float32)],
            ),
            compiler_params=pltpu.CompilerParams(
                dimension_semantics=("parallel", "arbitrary", "arbitrary"),
                vmem_limit_bytes=vmem_limit),
            cost_estimate=cost,
        )(x2, w1t, b1r, w2m, b2c)

    return out.reshape(N, C, H, W)


def calayer_reference(x, w1, b1, w2, b2):
    """Pure-JAX reference (exact erf GELU) for correctness checking."""
    y = jnp.mean(x, axis=(2, 3))                     # (N, C)
    z1 = y @ w1.T + b1                               # (N, Cr)
    z1 = jax.nn.gelu(z1, approximate=False)          # matches nn.GELU()
    z2 = z1 @ w2.T + b2                              # (N, C)
    s = jax.nn.sigmoid(z2)
    return x * s[:, :, None, None]


if __name__ == "__main__":
    # nn.Conv2d(nf, nf // reduction, 1) requires nf >= reduction; use nf=32.
    N, C, H, W = 2, 32, 16, 16
    reduction = 16
    Cr = C // reduction                              # = 2

    key = jax.random.PRNGKey(0)
    kx, kw1, kb1, kw2, kb2 = jax.random.split(key, 5)

    x = jax.random.normal(kx, (N, C, H, W), jnp.float32)

    # Conv2d(1x1) default-init-style uniform weights (fan_in = in_channels).
    s1 = 1.0 / (C ** 0.5)
    w1 = jax.random.uniform(kw1, (Cr, C), jnp.float32, -s1, s1)
    b1 = jax.random.uniform(kb1, (Cr,), jnp.float32, -s1, s1)
    s2 = 1.0 / (Cr ** 0.5)
    w2 = jax.random.uniform(kw2, (C, Cr), jnp.float32, -s2, s2)
    b2 = jax.random.uniform(kb2, (C,), jnp.float32, -s2, s2)

    # ---- Path A (fused slab-per-step) on the small example shape ----
    out = jax.block_until_ready(calayer_pallas(x, w1, b1, w2, b2))
    ref = calayer_reference(x, w1, b1, w2, b2)
    assert out.shape == (N, C, H, W)
    err_a = float(jnp.max(jnp.abs(out - ref)))
    assert jnp.allclose(out, ref, atol=1e-5, rtol=1e-5), err_a

    # ---- Path B (two-phase HW-tiled, large-image / v7x fallback), forced at a
    # small shape with HW not a multiple of 128 to exercise the lane mask ----
    N2, H2, W2 = 2, 10, 20                           # HW = 200
    x_b = jax.random.normal(kx, (N2, C, H2, W2), jnp.float32)
    out_b = jax.block_until_ready(calayer_pallas(x_b, w1, b1, w2, b2, hw_tile=128))
    ref_b = calayer_reference(x_b, w1, b1, w2, b2)
    err_b = float(jnp.max(jnp.abs(out_b - ref_b)))
    assert jnp.allclose(out_b, ref_b, atol=1e-5, rtol=1e-5), err_b

    print("KERNEL_OK")
</pallas_src>

<mosaic_0001>
module attributes {stable_mosaic.version = 11 : i64} {
  func.func @_calayer_kernel_fused(%arg0: i32, %arg1: memref<1x32x256xf32, #tpu.memory_space<vmem>>, %arg2: memref<32x2xf32, #tpu.memory_space<vmem>>, %arg3: memref<1x2xf32, #tpu.memory_space<vmem>>, %arg4: memref<32x2xf32, #tpu.memory_space<vmem>>, %arg5: memref<1x32xf32, #tpu.memory_space<vmem>>, %arg6: memref<1x32x256xf32, #tpu.memory_space<vmem>>) attributes {dimension_semantics = [#tpu.dimension_semantics<parallel>], iteration_bounds = array<i64: 2>, scalar_prefetch = 0 : i64, scratch_operands = 0 : i64, tpu.core_type = #tpu.core_type<tc>, window_params = [{transform_indices = @transform_0, window_bounds = array<i64: 1, 32, 256>}, {pipeline_mode = #tpu.pipeline_mode<synchronous>, transform_indices = @transform_1, window_bounds = array<i64: 32, 2>}, {pipeline_mode = #tpu.pipeline_mode<synchronous>, transform_indices = @transform_2, window_bounds = array<i64: 1, 2>}, {pipeline_mode = #tpu.pipeline_mode<synchronous>, transform_indices = @transform_3, window_bounds = array<i64: 32, 2>}, {pipeline_mode = #tpu.pipeline_mode<synchronous>, transform_indices = @transform_4, window_bounds = array<i64: 1, 32>}, {transform_indices = @transform_5, window_bounds = array<i64: 1, 32, 256>}]} {
    %c0 = arith.constant 0 : index
    %c0_0 = arith.constant 0 : index
    %c0_1 = arith.constant 0 : index
    %0 = vector.load %arg1[%c0, %c0_0, %c0_1] : memref<1x32x256xf32, #tpu.memory_space<vmem>>, vector<1x32x256xf32>
    %cst = arith.constant dense<0.000000e+00> : vector<1x32xf32>
    %1 = vector.multi_reduction <add>, %0, %cst [2] : vector<1x32x256xf32> to vector<1x32xf32>
    %2 = vector.shape_cast %1 : vector<1x32xf32> to vector<1x32x1xf32>
    %c0_2 = arith.constant 0 : index
    %c0_3 = arith.constant 0 : index
    %3 = vector.load %arg2[%c0_2, %c0_3] : memref<32x2xf32, #tpu.memory_space<vmem>>, vector<32x2xf32>
    %4 = vector.shape_cast %3 : vector<32x2xf32> to vector<1x32x2xf32>
    %5 = vector.broadcast %2 : vector<1x32x1xf32> to vector<1x32x2xf32>
    %6 = arith.mulf %5, %4 : vector<1x32x2xf32>
    %cst_4 = arith.constant dense<0.000000e+00> : vector<1x2xf32>
    %7 = vector.multi_reduction <add>, %6, %cst_4 [1] : vector<1x32x2xf32> to vector<1x2xf32>
    %c0_5 = arith.constant 0 : index
    %c0_6 = arith.constant 0 : index
    %8 = vector.load %arg3[%c0_5, %c0_6] : memref<1x2xf32, #tpu.memory_space<vmem>>, vector<1x2xf32>
    %9 = arith.addf %7, %8 : vector<1x2xf32>
    %cst_7 = arith.constant 0.707106769 : f32
    %10 = vector.broadcast %cst_7 : f32 to vector<1x2xf32>
    %11 = arith.mulf %9, %10 : vector<1x2xf32>
    %12 = math.absf %11 : vector<1x2xf32>
    %cst_8 = arith.constant 0.327591091 : f32
    %13 = vector.broadcast %cst_8 : f32 to vector<1x2xf32>
    %14 = arith.mulf %13, %12 : vector<1x2xf32>
    %cst_9 = arith.constant 1.000000e+00 : f32
    %15 = vector.broadcast %cst_9 : f32 to vector<1x2xf32>
    %16 = arith.addf %15, %14 : vector<1x2xf32>
    %cst_10 = arith.constant 1.000000e+00 : f32
    %17 = vector.broadcast %cst_10 : f32 to vector<1x2xf32>
    %18 = arith.divf %17, %16 : vector<1x2xf32>
    %cst_11 = arith.constant 1.06140542 : f32
    %19 = vector.broadcast %cst_11 : f32 to vector<1x2xf32>
    %20 = arith.mulf %18, %19 : vector<1x2xf32>
    %cst_12 = arith.constant -1.45315206 : f32
    %21 = vector.broadcast %cst_12 : f32 to vector<1x2xf32>
    %22 = arith.addf %21, %20 : vector<1x2xf32>
    %23 = arith.mulf %18, %22 : vector<1x2xf32>
    %cst_13 = arith.constant 1.42141378 : f32
    %24 = vector.broadcast %cst_13 : f32 to vector<1x2xf32>
    %25 = arith.addf %24, %23 : vector<1x2xf32>
    %26 = arith.mulf %18, %25 : vector<1x2xf32>
    %cst_14 = arith.constant -0.284496725 : f32
    %27 = vector.broadcast %cst_14 : f32 to vector<1x2xf32>
    %28 = arith.addf %27, %26 : vector<1x2xf32>
    %29 = arith.mulf %18, %28 : vector<1x2xf32>
    %cst_15 = arith.constant 0.254829586 : f32
    %30 = vector.broadcast %cst_15 : f32 to vector<1x2xf32>
    %31 = arith.addf %30, %29 : vector<1x2xf32>
    %32 = arith.mulf %18, %31 : vector<1x2xf32>
    %cst_16 = arith.constant 0.000000e+00 : f32
    %33 = vector.broadcast %cst_16 : f32 to vector<1x2xf32>
    %34 = arith.subf %33, %12 : vector<1x2xf32>
    %35 = arith.mulf %34, %12 : vector<1x2xf32>
    %36 = math.exp %35 : vector<1x2xf32>
    %37 = arith.mulf %32, %36 : vector<1x2xf32>
    %cst_17 = arith.constant 1.000000e+00 : f32
    %38 = vector.broadcast %cst_17 : f32 to vector<1x2xf32>
    %39 = arith.subf %38, %37 : vector<1x2xf32>
    %cst_18 = arith.constant 0.000000e+00 : f32
    %40 = vector.broadcast %cst_18 : f32 to vector<1x2xf32>
    %41 = arith.cmpf oge, %11, %40 : vector<1x2xf32>
    %cst_19 = arith.constant 0.000000e+00 : f32
    %42 = vector.broadcast %cst_19 : f32 to vector<1x2xf32>
    %43 = arith.subf %42, %39 : vector<1x2xf32>
    %44 = arith.select %41, %39, %43 : vector<1x2xi1>, vector<1x2xf32>
    %cst_20 = arith.constant 5.000000e-01 : f32
    %45 = vector.broadcast %cst_20 : f32 to vector<1x2xf32>
    %46 = arith.mulf %45, %9 : vector<1x2xf32>
    %cst_21 = arith.constant 1.000000e+00 : f32
    %47 = vector.broadcast %cst_21 : f32 to vector<1x2xf32>
    %48 = arith.addf %47, %44 : vector<1x2xf32>
    %49 = arith.mulf %46, %48 : vector<1x2xf32>
    %50 = vector.shape_cast %49 : vector<1x2xf32> to vector<1x1x2xf32>
    %c0_22 = arith.constant 0 : index
    %c0_23 = arith.constant 0 : index
    %51 = vector.load %arg4[%c0_22, %c0_23] : memref<32x2xf32, #tpu.memory_space<vmem>>, vector<32x2xf32>
    %52 = vector.shape_cast %51 : vector<32x2xf32> to vector<1x32x2xf32>
    %53 = vector.broadcast %50 : vector<1x1x2xf32> to vector<1x32x2xf32>
    %54 = arith.mulf %53, %52 : vector<1x32x2xf32>
    %cst_24 = arith.constant dense<0.000000e+00> : vector<1x32xf32>
    %55 = vector.multi_reduction <add>, %54, %cst_24 [2] : vector<1x32x2xf32> to vector<1x32xf32>
    %c0_25 = arith.constant 0 : index
    %c0_26 = arith.constant 0 : index
    %56 = vector.load %arg5[%c0_25, %c0_26] : memref<1x32xf32, #tpu.memory_space<vmem>>, vector<1x32xf32>
    %57 = arith.addf %55, %56 : vector<1x32xf32>
    %58 = arith.negf %57 : vector<1x32xf32>
    %59 = math.exp %58 : vector<1x32xf32>
    %cst_27 = arith.constant 1.000000e+00 : f32
    %60 = vector.broadcast %cst_27 : f32 to vector<1x32xf32>
    %61 = arith.addf %60, %59 : vector<1x32xf32>
    %62 = arith.divf %60, %61 : vector<1x32xf32>
    %63 = vector.shape_cast %62 : vector<1x32xf32> to vector<1x32x1xf32>
    %64 = vector.broadcast %63 : vector<1x32x1xf32> to vector<1x32x256xf32>
    %65 = arith.mulf %0, %64 : vector<1x32x256xf32>
    %c0_28 = arith.constant 0 : index
    %c0_29 = arith.constant 0 : index
    %c0_30 = arith.constant 0 : index
    %66 = vector.load %arg6[%c0_28, %c0_29, %c0_30] : memref<1x32x256xf32, #tpu.memory_space<vmem>>, vector<1x32x256xf32>
    tpu.vector_store %arg6[%c0_28, %c0_29, %c0_30], %65 {strides = array<i32>} : memref<1x32x256xf32, #tpu.memory_space<vmem>>, vector<1x32x256xf32>,
    return
  }
  func.func @transform_0(%arg0: i32) -> (i32, i32, i32) {
    %c0_i32 = arith.constant 0 : i32
    %c0_i32_0 = arith.constant 0 : i32
    %c0_i32_1 = arith.constant 0 : i32
    return %arg0, %c0_i32, %c0_i32_0 : i32, i32, i32
  }
  func.func @transform_1(%arg0: i32) -> (i32, i32) {
    %c0_i32 = arith.constant 0 : i32
    %c0_i32_0 = arith.constant 0 : i32
    %c0_i32_1 = arith.constant 0 : i32
    return %c0_i32, %c0_i32_0 : i32, i32
  }
  func.func @transform_2(%arg0: i32) -> (i32, i32) {
    %c0_i32 = arith.constant 0 : i32
    %c0_i32_0 = arith.constant 0 : i32
    %c0_i32_1 = arith.constant 0 : i32
    return %c0_i32, %c0_i32_0 : i32, i32
  }
  func.func @transform_3(%arg0: i32) -> (i32, i32) {
    %c0_i32 = arith.constant 0 : i32
    %c0_i32_0 = arith.constant 0 : i32
    %c0_i32_1 = arith.constant 0 : i32
    return %c0_i32, %c0_i32_0 : i32, i32
  }
  func.func @transform_4(%arg0: i32) -> (i32, i32) {
    %c0_i32 = arith.constant 0 : i32
    %c0_i32_0 = arith.constant 0 : i32
    %c0_i32_1 = arith.constant 0 : i32
    return %c0_i32, %c0_i32_0 : i32, i32
  }
  func.func @transform_5(%arg0: i32) -> (i32, i32, i32) {
    %c0_i32 = arith.constant 0 : i32
    %c0_i32_0 = arith.constant 0 : i32
    %c0_i32_1 = arith.constant 0 : i32
    return %arg0, %c0_i32, %c0_i32_0 : i32, i32, i32
  }
}

</mosaic_0001>

<bundles_post_ra>
// kernel: tpu_custom_call.1
= control target key start
LH: loop header
LB: loop body
LE: loop exit
PB: predicated region body
PF: predicated region fallthrough
CT: control target
= control target key end

     0   :  { %10 = vsyncpa [#allocation3], 0  ;;  %s967_s0 = inlined_call_operand.hbm [shape: f32[2,32,256], index: 0, kind: input, shape index: {}]   ;;  %s968_s1 = inlined_call_operand.vmem [shape: f32[32,2], index: 1, kind: input, shape index: {}]   ;;  %s969_s2 = inlined_call_operand.vmem [shape: f32[1,2], index: 2, kind: input, shape index: {}]   ;;  %s970_s3 = inlined_call_operand.vmem [shape: f32[32,2], index: 3, kind: input, shape index: {}]   ;;  %s971_s4 = inlined_call_operand.vmem [shape: f32[1,32], index: 4, kind: input, shape index: {}]   ;;  %s972_s5 = inlined_call_operand.hbm [shape: f32[2,32,256], index: 5, kind: output, shape index: {}]  }
   0x1   :  { %12 = vsyncpa [#allocation3 + $0x1], 0 }
   0x2   :  { %13 = vsyncpa [#allocation4], 0 }
   0x3   :  { %15 = vsyncpa [#allocation4 + $0x1], 0  ;;  %s739_s18 = smov 0   ;;  %s741_s19 = smov 0  }
   0x4   :  { %s743_s20 = smov 0   ;;  %s745_s21 = smov 0  }
   0x5 LB: > { %s760_s22 = sadd.s32 4294967295, %s700_s21   ;;  %s514_s23 = sadd.s32 4294967294, %s700_s21   ;;  %s700_s21 = sphi %s745_s21, %s987_s21   ;;  %s696_s20 = sphi %s743_s20, %s986_s20   ;;  %s692_s19 = sphi %s741_s19, %s985_s19   ;;  %s688_s18 = sphi %s739_s18, %s984_s18  }
   0x6   : > { %s764_s24 = sadd.s32 1, %s700_s21   ;;  %s28_s25 = sadd.s32 1, %s696_s20 }
   0x7   : > { %s25_s26 = ssub.s32 %s700_s21, %s764_s24  ;;  %p35_p0 = scmp.ne.s32.totalorder %s696_s20, %s692_s19 }
   0x8   : > { %p26_p1 = scmp.eq.s32.totalorder %s25_s26, 0  ;;  %p36_p2 = scmp.eq.s32.totalorder %s700_s21, 0 }
   0x9   : > { %p41_p3 = scmp.ne.s32.totalorder %s692_s19, %s688_s18  ;;  %p42_p4 = scmp.eq.s32.totalorder %s760_s22, 0 }
   0xa   : > { %s776_s27 = scalar_select %p26_p1, %s696_s20, %s28_s25  }
   0xb   : > { %p778_p5 = por %p36_p2, %p35_p0  ;;  %p782_p6 = por %p42_p4, %p41_p3 }
   0xc   : > { %p149_p7 = scmp.eq.s32.totalorder %s760_s22, 1  ;;  %p155_p8 = scmp.eq.s32.totalorder %s514_s23, 1 }
   0xd   : > { %s976_s29 = scalar_select %p782_p6, 1, 0 }
   0xe   : > { %p547_p10 = scmp.lt.s32.totalorder %s700_s21, 2  ;;  %p789_p11 = por %p149_p7, %p35_p0 }
   0xf   : > { %p793_p12 = por %p155_p8, %p41_p3  ;;  %s187_s7 = sand.u32 1, %s696_s20  }
  0x10   : > { %s977_s30 = scalar_select %p789_p11, 1, 0 }
  0x11   : > { %s978_s6 = scalar_select %p793_p12, 1, 0 }
  0x12   : > { %s533_s8 = sshll.u32 %s700_s21, 10  ;;  %s517_s9 = sshll.u32 %s187_s7, 6 }
  0x13   : > { %s802_s12 = scalar_lea.hbm %s967_s0, %s533_s8  ;;  %s191_s13 = scalar_lea.vmem [#allocation2], %s517_s9 }
  0x14   : > { %s198_s14 = sshll.u32 %s191_s13, 4  ;;  %p806_p13 = pnand %p547_p10, %p778_p5  ;;  %s810_s14 = int_to_ptr.vmem [resolvable:$true] %s198_s14 }
  0x15   : > { %s812_s16 = scalar_lea.sflag [#allocation3], %s187_s7  ;;  %s608_s17 = scalar_lea.hbm %s802_s12, 1024 }
  0x16   : > { %p609_p0 = scmp.ne.s32.totalorder %s802_s12, %s608_s17  ;;  %p610_p1 = pneg %p806_p13 }
  0x17   : > { %s613_s26 = scalar_lea.hbm %s967_s0, 2048  ;;  %p614_p4 = scmp.lt.s32.totalorder %s802_s12, %s967_s0 }
  0x18   : > { %p611_p2 = pnand %p610_p1, %p609_p0  ;;  %p615_p5 = scmp.lt.s32.totalorder %s613_s26, %s608_s17 }
  0x1a   : > { %p612_p3 = pneg %p611_p2  ;;  %p616_p7 = por %p615_p5, %p614_p4 }
  0x1c   : > { %p617_p8 = pnand %p616_p7, %p612_p3 }
  0x1e   : > { %620 = shalt.err (!%p617_p8)
}
  0x1f   : > { %s621_s7 = scalar_lea.vmem %s810_s14, 1024  ;;  %s702_s9 = smov [#allocation2]  }
  0x20   : > { %p622_p10 = scmp.ne.s32.totalorder %s810_s14, %s621_s7  ;;  %s626_s10 = sshll.u32 %s702_s9, 4  ;;  %s627_s10 = int_to_ptr.vmem [resolvable:$false] %s626_s10 }
  0x21   : > { %s628_s11 = scalar_lea.vmem %s627_s10, 2048  ;;  %p629_p2 = scmp.lt.s32.totalorder %s810_s14, %s627_s10 }
  0x22   : > { %p624_p9 = pnand %p622_p10, %p610_p1  ;;  %p630_p12 = scmp.lt.s32.totalorder %s628_s11, %s621_s7 }
  0x24   : > { %p625_p0 = pneg %p624_p9  ;;  %p631_p11 = por %p630_p12, %p629_p2 }
  0x26   : > { %p632_p6 = pnand %p631_p11, %p625_p0 }
  0x28   : > { %635 = shalt.err (!%p632_p6)
}
  0x29   : > { %s703_s13 = smov 256   ;;  %s704_s17 = smov 16  }
  0x2a   : > { %542 = dma.hbm_to_vmem [thread:$0]  (!%p806_p13), %s802_s12, 1024, %s810_s14, %s812_s16, %s703_s13, %s703_s13, %s704_s17  }
  0x2b   : > { %p520_p9 = scmp.ge.s32.totalorder %s700_s21, 1  ;;  %p206_p1 = scmp.lt.s32.totalorder %s700_s21, 3 }
  0x2d   : > { %p207_p3 = pnand %p520_p9, %p206_p1 }
  0x2e   : > { %s836_s23 = sand.u32 (!%p207_p3), 1, %s692_s19   ;;  %p980_p6 = scmp.ne.s32.totalorder (!%p207_p3), %s976_s29, 0 }
  0x2f   : > { %210 = sbr.rel (%p207_p3) target bundleno = 650 (0x28a), region = 40  ;;  %s521_s25 = sshll.u32 (!%p207_p3), %s836_s23, 6 }
  0x30   : > { %s213_s26 = scalar_lea.sflag (!%p207_p3), [#allocation3], %s836_s23  ;;  %s216_s28 = scalar_lea.vmem (!%p207_p3), [#allocation2], %s521_s25 }
  0x34   : > { %679 = dma.done.wait (%p980_p6), %s213_s26, 1024  }
  0x35   : > { %681 = vsyncadd (%p980_p6), %s213_s26, 4294966272  ;;  %v846_v0 = vld [vmem:[%s216_s28] sm:$0xff]  ;;  %v848_v1 = vld [vmem:[%s216_s28 + $0x8] sm:$0xff]  ;;  %vm271_vm0 = vcmask 15360   ;;  %v318_v57 = vlaneseq  ;;  %s242_s7 = scalar_lea.vmem [#allocation5], %s521_s25  ;;  %s534_s25 = sshll.u32 %s760_s22, 10 }
  0x36   : > { %v850_v2 = vld [vmem:[%s216_s28 + $0x20] sm:$0xff]  ;;  %v251_v3 = vadd.f32 %v848_v1, %v846_v0  ;;  %v854_v4 = vld [vmem:[%s216_s28 + $0x28] sm:$0xff]  ;;  %v856_v5 = vld [vmem:[%s216_s28 + $0x10] sm:$0xff]  ;;  %s441_s9 = sshll.u32 %s242_s7, 4  ;;  %s922_s13 = scalar_lea.hbm %s972_s5, %s534_s25  ;;  %s917_s9 = int_to_ptr.vmem [resolvable:$true] %s441_s9 }
  0x37   : > { %v858_v6 = vld [vmem:[%s216_s28 + $0x18] sm:$0xff]  ;;  %v257_v7 = vadd.f32 %v854_v4, %v850_v2  ;;  %v862_v8 = vld [vmem:[%s216_s28 + $0x30] sm:$0xff]  ;;  %v263_v12 = vld [vmem:[%s968_s1] sm:$0xff]  ;;  %v319_v60 = vshrl.u32 %v318_v57, 7  ;;  %s428_s17 = scalar_lea.sflag [#allocation4], %s836_s23  ;;  %s636_s26 = scalar_lea.vmem %s917_s9, 1024 }
  0x38   : > { %v864_v9 = vld [vmem:[%s216_s28 + $0x38] sm:$0xff]  ;;  %252 = vadd.xlane.f32.xlu0 %v251_v3  ;;  %v254_v10 = vadd.f32 %v858_v6, %v856_v5  ;;  %v265_v15 = vld [vmem:[%s968_s1 + $0x10] sm:$0xff]  ;;  %v264_v16 = vld [vmem:[%s968_s1 + $0x8] sm:$0xff]  ;;  %p637_p11 = scmp.ne.s32.totalorder %s917_s9, %s636_s26  ;;  %p981_p12 = scmp.ne.s32.totalorder %s977_s30, 0 }
  0x39   : > { %258 = vadd.xlane.f32.xlu1 %v257_v7  ;;  %v260_v11 = vadd.f32 %v864_v9, %v862_v8  ;;  %v266_v18 = vld [vmem:[%s968_s1 + $0x18] sm:$0xff]  ;;  %v285_v36 = vld [vmem:[%s969_s2] sm:$0x1]  ;;  %v320_v7 = vsub.s32 0, %v319_v60  ;;  %s706_s22 = smov [#allocation5]  }
  0x3a   : > { %p638_p13 = pnand %p637_p11, %p981_p12  ;;  %s640_s28 = sshll.u32 %s706_s22, 4  ;;  %s641_s28 = int_to_ptr.vmem [resolvable:$false] %s640_s28 }
  0x3b   : > { %s642_s29 = scalar_lea.vmem %s641_s28, 2048  ;;  %p643_p5 = scmp.lt.s32.totalorder %s917_s9, %s641_s28 }
  0x3c   : > { %255 = vadd.xlane.f32.xlu0 %v254_v10  ;;  %p639_p4 = pneg %p638_p13  ;;  %p644_p7 = scmp.lt.s32.totalorder %s642_s29, %s636_s26 }
  0x3d   : > { %261 = vadd.xlane.f32.xlu1 %v260_v11  ;;  %v315_v11 = vld [vmem:[%s970_s3 + $0x8] sm:$0xff] }
  0x3e   : > { %p645_p8 = por %p644_p7, %p643_p5 }
  0x40   : > { %p646_p10 = pnand %p645_p8, %p639_p4 }
  0xc1   : > { %v253_v13 = vpop.xlane.xlu0 %252 }
  0xc2   : > { %v259_v14 = vpop.xlane.xlu1 %258  ;;  %v267_v17 = vmul.f32 %v263_v12, %v253_v13  ;;  %v314_v12 = vld [vmem:[%s970_s3] sm:$0xff] }
  0xc3   : > { %v269_v20 = vmul.f32 %v265_v15, %v259_v14  ;;  %v316_v14 = vld [vmem:[%s970_s3 + $0x10] sm:$0xff] }
  0xc4   : > { %v272_v24 = vsel %vm271_vm0, %v267_v17, 0.0 }
  0xc5   : > { %v256_v19 = vpop.xlane.xlu0 %255  ;;  %v275_v27 = vsel %vm271_vm0, %v269_v20, 0.0 }
  0xc6   : > { %v268_v21 = vmul.f32 %v264_v16, %v256_v19  ;;  %v262_v22 = vpop.xlane.xlu1 %261 }
  0xc7   : > { %v270_v23 = vmul.f32 %v266_v18, %v262_v22  ;;  %v705_v22 = vmov 0  }
  0xc8   : > { %v273_v25 = vsel %vm271_vm0, %v268_v21, 0.0  ;;  %v523_v21 = vld [vmem:[%s971_s4] ss:$0 sm:$0xff]  ;;  %587 = vset.pattern.permute.xlu1 %v705_v22  ;;  %586 = vset.pattern.permute.xlu0 %v705_v22 }
  0xc9   : > { %v274_v26 = vadd.f32 %v273_v25, %v272_v24  ;;  %v277_v28 = vsel %vm271_vm0, %v270_v23, 0.0  ;;  %v317_v23 = vld [vmem:[%s970_s3 + $0x18] sm:$0xff] }
  0xcb   : > { %v276_v29 = vadd.f32 %v275_v27, %v274_v26 }
  0xcd   : > { %v278_v30 = vadd.f32 %v277_v28, %v276_v29 }
  0xcf   : > { %v279_v31 = vrot.slane %v278_v30, 4 }
  0xd1   : > { %v280_v32 = vadd.f32 %v279_v31, %v278_v30 }
  0xd3   : > { %v281_v33 = vrot.slane %v280_v32, 2 }
  0xd5   : > { %v282_v34 = vadd.f32 %v281_v33, %v280_v32 }
  0xd7   : > { %v283_v35 = vrot.slane %v282_v34, 1 }
  0xd9   : > { %v284_v37 = vadd.f32 %v283_v35, %v282_v34 }
  0xdb   : > { %v286_v38 = vadd.f32 %v285_v36, %v284_v37 }
  0xdd   : > { %v287_v39 = vmul.f32 0.70710677, %v286_v38  ;;  %v311_v63 = vmul.f32 0.5, %v286_v38 }
  0xdf   : > { %v288_v40 = vand.u32 2147483647, %v287_v39  ;;  %vm308_vm1 = vcmp.ge.f32.partialorder %v287_v39, 0.0 }
  0xe1   : > { %v289_v41 = vmul.f32 0.3275911, %v288_v40  ;;  %v302_v43 = vsub.f32 0.0, %v288_v40 }
  0xe3   : > { %v290_v42 = vadd.f32 1.0, %v289_v41  ;;  %v303_v44 = vmul.f32 %v302_v43, %v288_v40 }
  0xe5   : > { %588 = vrcp.f32 %v290_v42  ;;  %v304_v46 = vmul.f32 1.442695, %v303_v44 }
  0xe7   : > { %590 = vpow2.f32 %v304_v46 }
  0xf2   : > { %v589_v45 = vpop.eup %588 }
  0xf3   : > { %v293_v47 = vmul.f32 1.0614054, %v589_v45 }
  0xf4   : > { %v591_v56 = vpop.eup %590 }
  0xf5   : > { %v294_v48 = vadd.f32 -1.4531521, %v293_v47 }
  0xf7   : > { %v295_v49 = vmul.f32 %v589_v45, %v294_v48 }
  0xf9   : > { %v296_v50 = vadd.f32 1.4214138, %v295_v49 }
  0xfb   : > { %v297_v51 = vmul.f32 %v589_v45, %v296_v50 }
  0xfd   : > { %v298_v52 = vadd.f32 -0.28449672, %v297_v51 }
  0xff   : > { %v299_v53 = vmul.f32 %v589_v45, %v298_v52 }
 0x101   : > { %v300_v54 = vadd.f32 0.2548296, %v299_v53 }
 0x103   : > { %v301_v55 = vmul.f32 %v589_v45, %v300_v54 }
 0x105   : > { %v306_v58 = vmul.f32 %v591_v56, %v301_v55 }
 0x107   : > { %v307_v59 = vsub.f32 1.0, %v306_v58 }
 0x109   : > { %v309_v61 = vsub.f32 0.0, %v307_v59 }
 0x10b   : > { %v310_v62 = vsel %vm308_vm1, %v307_v59, %v309_v61 }
 0x10c   : > { %v312_v3 = vadd.f32 1.0, %v310_v62 }
 0x10e   : > { %v313_v10 = vmul.f32 %v312_v3, %v311_v63 }
 0x110   : > { %v321_v13 = vrot.slane %v313_v10, %v320_v7 }
 0x112   : > { %v323_v15 = vmul.f32 %v321_v13, %v315_v11  ;;  %v322_v16 = vmul.f32 %v321_v13, %v314_v12  ;;  %v324_v19 = vmul.f32 %v321_v13, %v316_v14  ;;  %v325_v24 = vmul.f32 %v321_v13, %v317_v23 }
 0x114   : > { %v329_v17 = vsel %vm271_vm0, %v323_v15, 0.0  ;;  %v326_v18 = vsel %vm271_vm0, %v322_v16, 0.0  ;;  %v332_v20 = vsel %vm271_vm0, %v324_v19, 0.0  ;;  %v335_v25 = vsel %vm271_vm0, %v325_v24, 0.0 }
 0x115   : > { %330 = vadd.xlane.f32.xlu1 %v329_v17  ;;  %327 = vadd.xlane.f32.xlu0 %v326_v18 }
 0x119   : > { %333 = vadd.xlane.f32.xlu0 %v332_v20 }
 0x126   : > { %349 = vbcast.lane.b32.xlu1 %v523_v21, 264 }
 0x12a   : > { %353 = vbcast.lane.b32.xlu1 %v523_v21, 272 }
 0x12f   : > { %345 = vbcast.lane.b32.xlu0 %v523_v21, 256 }
 0x14e   : > { %336 = vadd.xlane.f32.xlu1 %v335_v25 }
 0x15f   : > { %357 = vbcast.lane.b32.xlu1 %v523_v21, 280 }
 0x19e   : > { %v331_v26 = vpop.xlane.xlu1 %330  ;;  %v328_v27 = vpop.xlane.xlu0 %327 }
 0x1a2   : > { %v350_v28 = vpop.permute.xlu1 %349  ;;  %v334_v29 = vpop.xlane.xlu0 %333 }
 0x1a3   : > { %v364_v30 = vadd.f32 %v350_v28, %v331_v26 }
 0x1a5   : > { %v525_v31 = vmul.f32 -1.442695, %v364_v30 }
 0x1a6   : > { %v354_v32 = vpop.permute.xlu1 %353  ;;  %v346_v33 = vpop.permute.xlu0 %345 }
 0x1a7   : > { %592 = vpow2.f32 %v525_v31  ;;  %v365_v34 = vadd.f32 %v354_v32, %v334_v29  ;;  %v363_v35 = vadd.f32 %v346_v33, %v328_v27 }
 0x1a9   : > { %v526_v36 = vmul.f32 -1.442695, %v365_v34  ;;  %v524_v37 = vmul.f32 -1.442695, %v363_v35 }
 0x1ab   : > { %594 = vpow2.f32 %v526_v36 }
 0x1ac   : > { %596 = vpow2.f32 %v524_v37 }
 0x1b4   : > { %v593_v38 = vpop.eup %592 }
 0x1b5   : > { %v380_v39 = vadd.f32 1.0, %v593_v38 }
 0x1b7   : > { %598 = vrcp.f32 %v380_v39 }
 0x1b8   : > { %v595_v40 = vpop.eup %594 }
 0x1b9   : > { %v597_v41 = vpop.eup %596  ;;  %v381_v42 = vadd.f32 1.0, %v595_v40 }
 0x1ba   : > { %v379_v43 = vadd.f32 1.0, %v597_v41 }
 0x1bb   : > { %600 = vrcp.f32 %v381_v42 }
 0x1bc   : > { %602 = vrcp.f32 %v379_v43 }
 0x1c4   : > { %v599_v44 = vpop.eup %598 }
 0x1c5   : > { %398 = vperm.xlu1 %587, %v599_v44  }
 0x1c8   : > { %v601_v45 = vpop.eup %600 }
 0x1c9   : > { %v603_v46 = vpop.eup %602  ;;  %403 = vperm.xlu1 %587, %v601_v45  }
 0x1ca   : > { %393 = vperm.xlu0 %586, %v603_v46  }
 0x1d7   : > { %v337_v47 = vpop.xlane.xlu1 %336 }
 0x1db   : > { %v358_v48 = vpop.permute.xlu1 %357 }
 0x1dc   : > { %v366_v49 = vadd.f32 %v358_v48, %v337_v47 }
 0x1de   : > { %v527_v50 = vmul.f32 -1.442695, %v366_v49 }
 0x1e0   : > { %604 = vpow2.f32 %v527_v50 }
 0x1ed   : > { %v605_v51 = vpop.eup %604 }
 0x1ee   : > { %v382_v52 = vadd.f32 1.0, %v605_v51 }
 0x1f0   : > { %606 = vrcp.f32 %v382_v52 }
 0x1fd   : > { %v607_v53 = vpop.eup %606 }
 0x1fe   : > { %408 = vperm.xlu0 %586, %v607_v53  }
 0x240   : > { %v399_v54 = vpop.permute.xlu1 %398 }
 0x241   : > { %v413_v55 = vmul.f32 %v399_v54, %v856_v5  ;;  %v414_v56 = vmul.f32 %v399_v54, %v858_v6 }
 0x243   : > { %421 = vst [vmem:[%s242_s7 + $0x10] sm:$0xff] %v413_v55  ;;  %422 = vst [vmem:[%s242_s7 + $0x18] sm:$0xff] %v414_v56 }
 0x244   : > { %v404_v57 = vpop.permute.xlu1 %403 }
 0x245   : > { %v415_v58 = vmul.f32 %v404_v57, %v850_v2  ;;  %v416_v59 = vmul.f32 %v404_v57, %v854_v4  ;;  %v394_v60 = vpop.permute.xlu0 %393 }
 0x246   : > { %v411_v61 = vmul.f32 %v394_v60, %v846_v0  ;;  %v412_v62 = vmul.f32 %v394_v60, %v848_v1 }
 0x247   : > { %423 = vst [vmem:[%s242_s7 + $0x20] sm:$0xff] %v415_v58  ;;  %424 = vst [vmem:[%s242_s7 + $0x28] sm:$0xff] %v416_v59 }
 0x248   : > { %419 = vst [vmem:[%s242_s7] sm:$0xff] %v411_v61  ;;  %420 = vst [vmem:[%s242_s7 + $0x8] sm:$0xff] %v412_v62 }
 0x279   : > { %v409_v2 = vpop.permute.xlu0 %408 }
 0x27a   : > { %v417_v0 = vmul.f32 %v409_v2, %v862_v8  ;;  %v418_v1 = vmul.f32 %v409_v2, %v864_v9 }
 0x27c   : > { %425 = vst [vmem:[%s242_s7 + $0x30] sm:$0xff] %v417_v0  ;;  %426 = vst [vmem:[%s242_s7 + $0x38] sm:$0xff] %v418_v1 }
 0x27d   : > { %649 = shalt.err (!%p646_p10)
}
 0x27e   : > { %s650_s12 = scalar_lea.hbm %s922_s13, 1024  ;;  %s654_s16 = scalar_lea.hbm %s972_s5, 2048 }
 0x27f   : > { %p651_p0 = scmp.ne.s32.totalorder %s922_s13, %s650_s12  ;;  %p655_p1 = scmp.lt.s32.totalorder %s922_s13, %s972_s5 }
 0x280   : > { %p656_p3 = scmp.lt.s32.totalorder %s654_s16, %s650_s12 }
 0x281   : > { %p652_p2 = pnand %p651_p0, %p981_p12 }
 0x282   : > { %p657_p6 = por %p656_p3, %p655_p1 }
 0x283   : > { %p653_p9 = pneg %p652_p2 }
 0x285   : > { %p658_p11 = pnand %p657_p6, %p653_p9 }
 0x287   : > { %661 = shalt.err (!%p658_p11)
}
 0x288   : > { %s707_s25 = smov 256   ;;  %s708_s10 = smov 16  }
 0x289   : > { %537 = dma.vmem_to_hbm [thread:$0]  (%p981_p12), %s917_s9, 1024, %s922_s13, %s428_s17, %s707_s25, %s707_s25, %s708_s10  }
 0x28a PF: > { %s456_s11 = sand.u32 1, %s688_s18   ;;  %p982_p13 = scmp.ne.s32.totalorder %s978_s6, 0 }
 0x28b   : > { %p983_p4 = scmp.ge.s32.totalorder %s700_s21, 2  ;;  %s457_s26 = scalar_lea.sflag [#allocation4], %s456_s11 }
 0x28d   : > { %p544_p5 = pnand %p983_p4, %p982_p13 }
 0x28f   : > { %p545_p7 = pneg %p544_p5 }
 0x291   : > { %683 = dma.done.wait (%p545_p7), %s457_s26, 1024  }
 0x292   : > { %685 = vsyncadd (%p545_p7), %s457_s26, 4294966272  ;;  %p18_p8 = scmp.ge.s32.totalorder %s764_s24, 4   ;;  %s984_s18 = smov %s692_s19 }
 0x293   : > { %s985_s19 = smov %s696_s20  ;;  %s986_s20 = smov %s776_s27 }
 0x294   : > { %s987_s21 = smov %s764_s24  ;;  %20 = sbr.rel (!%p18_p8) target bundleno = 5 (0x5), region = 85 }
 0x299   :  { %462 = vsyncpa [#allocation3], 1 }
 0x29a   :  { %464 = vsyncpa [#allocation3 + $0x1], 1 }
 0x29b   :  { %465 = vsyncpa [#allocation4], 1 }
 0x29c   :  { %467 = vsyncpa [#allocation4 + $0x1], 1 }

</bundles_post_ra>
